<compile_context>
chip_gen: v6e
topology: v6e:2x2x1
jax: 0.10.0
libtpu: 0.0.40
codegen_flags: <defaults>
</compile_context>

<pallas_src>
import functools

import jax
import jax.numpy as jnp
from jax.experimental import pallas as pl
from jax.experimental.pallas import tpu as pltpu

BN_EPS = 1e-5
_VMEM_LIMIT = 32 * 1024 * 1024


# ---------------------------------------------------------------------------
# Kernel 1: fused im2col (space-to-depth taps -> K=256 tile in VMEM) + MXU GEMM
#           + frozen-BN bias + ReLU, bf16 output, invalid rows/cols zeroed.
# ---------------------------------------------------------------------------
def _stem_conv_kernel(x_ref, w_ref, b_ref, o_ref, a_ref, *, trows, owp, oh, ow):
    # x_ref: (1, 1, trows+3, Wq, 16) bf16   s2d input rows for this tile (+3 halo)
    # w_ref: (256, OC) bf16                 folded weights, K = 4x4 taps x 16 ch
    # b_ref: (1, OC) f32                    frozen-BN bias
    # o_ref: (1, trows, OWp, OC) bf16
    # a_ref: (OWp, 256) bf16                per-row im2col scratch
    t = pl.program_id(1)
    col_ok = jax.lax.broadcasted_iota(jnp.int32, (owp, 1), 0) < ow
    w = w_ref[...]
    b = b_ref[...]

    def body(r, carry):
        # Build the (OWp, 256) patch tile for conv-output row r entirely in VMEM.
        for i in range(4):                       # row-pair taps
            row = x_ref[0, 0, r + i, :, :]       # (Wq, 16) bf16
            for j in range(4):                   # col-pair taps
                k0 = (i * 4 + j) * 16
                a_ref[:, k0:k0 + 16] = row[j:j + owp, :]
        acc = jnp.dot(a_ref[...], w, preferred_element_type=jnp.float32)
        acc = jnp.maximum(acc + b, 0.0)
        # zero rows/cols beyond the true conv output so the pool's 0-padding is exact
        valid = jnp.logical_and((t * trows + r) < oh, col_ok)
        acc = jnp.where(valid, acc, 0.0)
        o_ref[0, r, :, :] = acc.astype(o_ref.dtype)
        return carry

    jax.lax.fori_loop(0, trows, body, 0)


def conv_stem_pallas(xqb, w256, bias, *, nb, trows, owp, oh, ow):
    n = xqb.shape[0]
    wq = xqb.shape[3]
    oc = w256.shape[1]
    ohp = nb * trows
    kernel = functools.partial(_stem_conv_kernel, trows=trows, owp=owp, oh=oh, ow=ow)
    return pl.pallas_call(
        kernel,
        out_shape=jax.ShapeDtypeStruct((n, ohp, owp, oc), jnp.bfloat16),
        grid=(n, nb),
        in_specs=[
            pl.BlockSpec((1, 1, trows + 3, wq, 16), lambda b, t: (b, t, 0, 0, 0)),
            pl.BlockSpec((256, oc), lambda b, t: (0, 0)),   # weights stay resident
            pl.BlockSpec((1, oc), lambda b, t: (0, 0)),
        ],
        out_specs=pl.BlockSpec((1, trows, owp, oc), lambda b, t: (b, t, 0, 0)),
        scratch_shapes=[pltpu.VMEM((owp, 256), jnp.bfloat16)],
        compiler_params=pltpu.CompilerParams(
            dimension_semantics=("parallel", "parallel"),
            vmem_limit_bytes=_VMEM_LIMIT),
    )(xqb, w256, bias)


# ---------------------------------------------------------------------------
# Kernel 2: fused 3x3 / stride-2 / pad-1 max pool on the (row-pair, col-pair)
#           packed conv output.  Top-row halo via a clamped second BlockSpec
#           (masked at t==0); left-column boundary via split stores.  No pad
#           pass, no in-kernel concatenate.
# ---------------------------------------------------------------------------
def _maxpool_kernel(m_ref, h_ref, o_ref, *, tpr, oc, owh):
    # m_ref: (1, tpr, 2, OWh, 2*OC) bf16   conv row-pairs for this tile
    # h_ref: (1, 1,  2, OWh, 2*OC) bf16    previous row-pair (garbage when t==0)
    # o_ref: (1, tpr, OWh, OC) bf16
    t = pl.program_id(1)

    def body(j, carry):
        e = m_ref[0, j, 0, :, :]                    # conv row 2p        (OWh, 2*OC)
        o1 = m_ref[0, j, 1, :, :]                   # conv row 2p+1
        jm1 = jnp.maximum(j - 1, 0)
        prev_in = m_ref[0, jm1, 1, :, :]            # conv row 2p-1 for j >= 1
        halo = h_ref[0, 0, 1, :, :]                 # conv row 2p-1 for j == 0, t > 0
        prev = jnp.where(j == 0,
                         jnp.where(t > 0, halo, jnp.zeros_like(halo)),
                         prev_in)
        v = jnp.maximum(jnp.maximum(e, o1), prev)   # vertical max       (OWh, 2*OC)
        vc = jnp.maximum(v[:, :oc], v[:, oc:])      # cols 2q, 2q+1      (PW, OC)
        o_ref[0, j, 0:1, :] = vc[0:1].astype(o_ref.dtype)        # q == 0: no col -1
        if owh > 1:
            vo = v[:, oc:]                                        # col 2q+1
            o_ref[0, j, 1:, :] = jnp.maximum(vc[1:], vo[:-1]).astype(o_ref.dtype)
        return carry

    jax.lax.fori_loop(0, tpr, body, 0)


def maxpool3x3s2_pallas(y2, *, tpr):
    n, php, _, owh, c2 = y2.shape
    oc = c2 // 2
    nb = php // tpr
    kernel = functools.partial(_maxpool_kernel, tpr=tpr, oc=oc, owh=owh)
    return pl.pallas_call(
        kernel,
        out_shape=jax.ShapeDtypeStruct((n, php, owh, oc), y2.dtype),
        grid=(n, nb),
        in_specs=[
            pl.BlockSpec((1, tpr, 2, owh, c2), lambda b, t: (b, t, 0, 0, 0)),
            pl.BlockSpec((1, 1, 2, owh, c2),
                         lambda b, t: (b, jnp.maximum(t * tpr - 1, 0), 0, 0, 0)),
        ],
        out_specs=pl.BlockSpec((1, tpr, owh, oc), lambda b, t: (b, t, 0, 0)),
        compiler_params=pltpu.CompilerParams(
            dimension_semantics=("parallel", "parallel"),
            vmem_limit_bytes=_VMEM_LIMIT),
    )(y2, y2)


# ---------------------------------------------------------------------------
# JAX glue: space-to-depth input repack, BN folding, tap-ordered weight matrix
# ---------------------------------------------------------------------------
def _pick_tpr(ph, owh, oc, n_batch):
    # bytes of one conv row-pair (pool row) in the bf16 packed layout
    row_bytes = 2 * (2 * owh) * oc * 2
    tpr = max(1, min(ph, (2 * 1024 * 1024) // max(1, row_bytes)))
    if n_batch == 1 and ph >= 2:
        tpr = min(tpr, max(1, ph // 2))   # keep >=2 row tiles so both v7x TCs get work
    return tpr


def backbone_stem(images_nchw, params):
    n, ic, h, w = images_nchw.shape
    oc = params["conv_w"].shape[0]
    oh = (h - 1) // 2 + 1
    ow = (w - 1) // 2 + 1
    ph = (oh - 1) // 2 + 1
    owp = 2 * ((ow + 1) // 2)            # conv-out width rounded up to even
    owh = owp // 2                       # == pooled width PW
    tpr = _pick_tpr(ph, owh, oc, n)      # pool rows per tile
    nb = pl.cdiv(ph, tpr)
    php = nb * tpr
    trows = 2 * tpr                      # conv rows per tile
    ohp = 2 * php
    wq = owp + 3
    hq = ohp + 3

    # input: NCHW -> NHWC bf16, conv padding folded in, space-to-depth(2x2) -> 16 ch
    x = jnp.transpose(images_nchw, (0, 2, 3, 1)).astype(jnp.bfloat16)
    xp = jnp.pad(x, ((0, 0), (3, 2 * hq - 3 - h), (3, 2 * wq - 3 - w), (0, 0)))
    xq = xp.reshape(n, hq, 2, wq, 2, ic)
    xq = jnp.transpose(xq, (0, 1, 3, 2, 4, 5)).reshape(n, hq, wq, 4 * ic)
    xq = jnp.pad(xq, ((0, 0), (0, 0), (0, 0), (0, 16 - 4 * ic)))
    # per-row-tile input blocks with a 3-row halo (tiny, input-sized HBM duplication;
    # removes the need for halo BlockSpecs / in-kernel row concatenation in the conv)
    xqb = jnp.stack(
        [jax.lax.slice_in_dim(xq, tt * trows, tt * trows + trows + 3, axis=1)
         for tt in range(nb)], axis=1)                 # (N, nb, trows+3, Wq, 16)

    # frozen BN (eval) folded into the weights; remap 7x7 taps to the s2d order, K=256
    scale = params["bn_gamma"] / jnp.sqrt(params["bn_var"] + BN_EPS)
    bias = params["bn_beta"] - params["bn_mean"] * scale
    wf = params["conv_w"] * scale[:, None, None, None]          # (OC, 3, 7, 7)
    wf = jnp.pad(wf, ((0, 0), (0, 0), (0, 1), (0, 1)))          # 7x7 -> 8x8 (zero taps)
    wf = wf.reshape(oc, ic, 4, 2, 4, 2)                         # (oc, c, i, py, j, px)
    wf = jnp.transpose(wf, (2, 4, 3, 5, 1, 0)).reshape(4, 4, 4 * ic, oc)
    wf = jnp.pad(wf, ((0, 0), (0, 0), (0, 16 - 4 * ic), (0, 0)))
    w256 = wf.reshape(256, oc).astype(jnp.bfloat16)
    bias = bias.reshape(1, oc).astype(jnp.float32)

    y = conv_stem_pallas(xqb, w256, bias, nb=nb, trows=trows, owp=owp, oh=oh, ow=ow)

    # free (metadata-only) repack for the pool: rows -> (row-pair, parity),
    # cols -> (col-pair, parity*channels)
    y2 = y.reshape(n, php, 2, owh, 2 * oc)
    p = maxpool3x3s2_pallas(y2, tpr=tpr)                        # (N, PHp, PW, OC) bf16

    # TODO(synk): skip this slice/cast/transpose if the consumer accepts NHWC bf16.
    return jnp.transpose(p[:, :ph].astype(jnp.float32), (0, 3, 1, 2))


def generalized_rcnn_inference(images, image_shapes, scales_yx, params):
    # matches GeneralizedRCNN.inference: original_sizes computed, only features returned
    original_sizes = image_shapes * scales_yx
    del original_sizes
    return backbone_stem(images, params)


# ---------------------------------------------------------------------------
# pure-JAX reference (sanity check) and parameter construction
# ---------------------------------------------------------------------------
def _reference_stem(images, params):
    x = jnp.transpose(images, (0, 2, 3, 1)).astype(jnp.float32)
    w = params["conv_w"]
    scale = params["bn_gamma"] / jnp.sqrt(params["bn_var"] + BN_EPS)
    bias = params["bn_beta"] - params["bn_mean"] * scale
    w_hwio = jnp.transpose(w * scale[:, None, None, None], (2, 3, 1, 0))
    y = jax.lax.conv_general_dilated(
        x, w_hwio, window_strides=(2, 2), padding=((3, 3), (3, 3)),
        dimension_numbers=("NHWC", "HWIO", "NHWC"),
        precision=jax.lax.Precision.HIGHEST)
    y = jnp.maximum(y + bias, 0.0)
    p = jax.lax.reduce_window(y, -jnp.inf, jax.lax.max,
                              (1, 3, 3, 1), (1, 2, 2, 1),
                              ((0, 0), (1, 1), (1, 1), (0, 0)))
    return jnp.transpose(p, (0, 3, 1, 2))


def make_params(key, in_ch=3, out_ch=64, k=7):
    k0, k1 = jax.random.split(key)
    conv_w = 0.05 * jax.random.normal(k0, (out_ch, in_ch, k, k), jnp.float32)
    bn_gamma = 1.0 + 0.01 * jax.random.normal(k1, (out_ch,), jnp.float32)
    bn_beta = 0.01 * jnp.arange(out_ch, dtype=jnp.float32)
    bn_mean = jnp.zeros((out_ch,), jnp.float32)
    bn_var = jnp.ones((out_ch,), jnp.float32)
    return dict(conv_w=conv_w, bn_gamma=bn_gamma, bn_beta=bn_beta,
                bn_mean=bn_mean, bn_var=bn_var)


if __name__ == "__main__":
    key = jax.random.PRNGKey(0)
    k_img, k_par = jax.random.split(key)

    images = jax.random.normal(k_img, (2, 3, 32, 32), jnp.float32)     # NCHW, like torch
    image_shapes = jnp.array([[32.0, 32.0], [32.0, 32.0]], jnp.float32)
    scales_yx = jnp.array([[1.0, 1.0], [0.5, 0.5]], jnp.float32)
    params = make_params(k_par)

    fwd = jax.jit(generalized_rcnn_inference)
    feats = jax.block_until_ready(fwd(images, image_shapes, scales_yx, params))
    assert feats.shape == (2, 64, 8, 8), feats.shape

    ref = jax.block_until_ready(_reference_stem(images, params))
    err = float(jnp.max(jnp.abs(feats - ref)))
    assert err < 0.1, f"max abs err vs reference: {err}"                # bf16 MXU tolerance
    print("KERNEL_OK")
</pallas_src>

<mosaic_0001>
module attributes {stable_mosaic.version = 11 : i64} {
  func.func @_stem_conv_kernel(%arg0: i32, %arg1: i32, %arg2: memref<1x1x19x19x16xbf16, #tpu.memory_space<vmem>>, %arg3: memref<256x64xbf16, #tpu.memory_space<vmem>>, %arg4: memref<1x64xf32, #tpu.memory_space<vmem>>, %arg5: memref<1x16x16x64xbf16, #tpu.memory_space<vmem>>, %arg6: memref<16x256xbf16, #tpu.memory_space<vmem>>) attributes {dimension_semantics = [#tpu.dimension_semantics<parallel>, #tpu.dimension_semantics<parallel>], iteration_bounds = array<i64: 2, 1>, scalar_prefetch = 0 : i64, scratch_operands = 1 : i64, tpu.core_type = #tpu.core_type<tc>, window_params = [{transform_indices = @transform_0, window_bounds = array<i64: 1, 1, 19, 19, 16>}, {pipeline_mode = #tpu.pipeline_mode<synchronous>, transform_indices = @transform_1, window_bounds = array<i64: 256, 64>}, {pipeline_mode = #tpu.pipeline_mode<synchronous>, transform_indices = @transform_2, window_bounds = array<i64: 1, 64>}, {transform_indices = @transform_3, window_bounds = array<i64: 1, 16, 16, 64>}]} {
    %0 = tpu.iota {dimensions = array<i32: 0>} : vector<16x1xi32>
    %c16_i32 = arith.constant 16 : i32
    %1 = vector.broadcast %c16_i32 : i32 to vector<16x1xi32>
    %2 = arith.cmpi slt, %0, %1 : vector<16x1xi32>
    %c0 = arith.constant 0 : index
    %c0_0 = arith.constant 0 : index
    %3 = vector.load %arg3[%c0, %c0_0] : memref<256x64xbf16, #tpu.memory_space<vmem>>, vector<256x64xbf16>
    %c0_1 = arith.constant 0 : index
    %c0_2 = arith.constant 0 : index
    %4 = vector.load %arg4[%c0_1, %c0_2] : memref<1x64xf32, #tpu.memory_space<vmem>>, vector<1x64xf32>
    %c0_i32 = arith.constant 0 : i32
    %c16_i32_3 = arith.constant 16 : i32
    %5 = arith.addi %c0_i32, %c16_i32_3 : i32
    %c1_i32 = arith.constant 1 : i32
    scf.for %arg7 = %c0_i32 to %5 step %c1_i32  : i32 {
      %c0_i32_5 = arith.constant 0 : i32
      %6 = arith.addi %arg7, %c0_i32_5 : i32
      %c0_6 = arith.constant 0 : index
      %c0_7 = arith.constant 0 : index
      %7 = arith.index_cast %6 : i32 to index
      %c0_8 = arith.constant 0 : index
      %c0_9 = arith.constant 0 : index
      %8 = vector.load %arg2[%c0_6, %c0_7, %7, %c0_8, %c0_9] : memref<1x1x19x19x16xbf16, #tpu.memory_space<vmem>>, vector<1x1x1x19x16xbf16>
      %9 = vector.shape_cast %8 : vector<1x1x1x19x16xbf16> to vector<19x16xbf16>
      %10 = vector.extract_strided_slice %9 {offsets = [0, 0], sizes = [16, 16], strides = [1, 1]} : vector<19x16xbf16> to vector<16x16xbf16>
      %c0_10 = arith.constant 0 : index
      %c0_11 = arith.constant 0 : index
      %11 = vector.load %arg6[%c0_10, %c0_11] : memref<16x256xbf16, #tpu.memory_space<vmem>>, vector<16x16xbf16>
      tpu.vector_store %arg6[%c0_10, %c0_11], %10 {strides = array<i32>} : memref<16x256xbf16, #tpu.memory_space<vmem>>, vector<16x16xbf16>,
      %12 = vector.extract_strided_slice %9 {offsets = [1, 0], sizes = [16, 16], strides = [1, 1]} : vector<19x16xbf16> to vector<16x16xbf16>
      %c0_12 = arith.constant 0 : index
      %c16 = arith.constant 16 : index
      %13 = vector.load %arg6[%c0_12, %c16] : memref<16x256xbf16, #tpu.memory_space<vmem>>, vector<16x16xbf16>
      tpu.vector_store %arg6[%c0_12, %c16], %12 {strides = array<i32>} : memref<16x256xbf16, #tpu.memory_space<vmem>>, vector<16x16xbf16>,
      %14 = vector.extract_strided_slice %9 {offsets = [2, 0], sizes = [16, 16], strides = [1, 1]} : vector<19x16xbf16> to vector<16x16xbf16>
      %c0_13 = arith.constant 0 : index
      %c32 = arith.constant 32 : index
      %15 = vector.load %arg6[%c0_13, %c32] : memref<16x256xbf16, #tpu.memory_space<vmem>>, vector<16x16xbf16>
      tpu.vector_store %arg6[%c0_13, %c32], %14 {strides = array<i32>} : memref<16x256xbf16, #tpu.memory_space<vmem>>, vector<16x16xbf16>,
      %16 = vector.extract_strided_slice %9 {offsets = [3, 0], sizes = [16, 16], strides = [1, 1]} : vector<19x16xbf16> to vector<16x16xbf16>
      %c0_14 = arith.constant 0 : index
      %c48 = arith.constant 48 : index
      %17 = vector.load %arg6[%c0_14, %c48] : memref<16x256xbf16, #tpu.memory_space<vmem>>, vector<16x16xbf16>
      tpu.vector_store %arg6[%c0_14, %c48], %16 {strides = array<i32>} : memref<16x256xbf16, #tpu.memory_space<vmem>>, vector<16x16xbf16>,
      %c1_i32_15 = arith.constant 1 : i32
      %18 = arith.addi %arg7, %c1_i32_15 : i32
      %c0_16 = arith.constant 0 : index
      %c0_17 = arith.constant 0 : index
      %19 = arith.index_cast %18 : i32 to index
      %c0_18 = arith.constant 0 : index
      %c0_19 = arith.constant 0 : index
      %20 = vector.load %arg2[%c0_16, %c0_17, %19, %c0_18, %c0_19] : memref<1x1x19x19x16xbf16, #tpu.memory_space<vmem>>, vector<1x1x1x19x16xbf16>
      %21 = vector.shape_cast %20 : vector<1x1x1x19x16xbf16> to vector<19x16xbf16>
      %22 = vector.extract_strided_slice %21 {offsets = [0, 0], sizes = [16, 16], strides = [1, 1]} : vector<19x16xbf16> to vector<16x16xbf16>
      %c0_20 = arith.constant 0 : index
      %c64 = arith.constant 64 : index
      %23 = vector.load %arg6[%c0_20, %c64] : memref<16x256xbf16, #tpu.memory_space<vmem>>, vector<16x16xbf16>
      tpu.vector_store %arg6[%c0_20, %c64], %22 {strides = array<i32>} : memref<16x256xbf16, #tpu.memory_space<vmem>>, vector<16x16xbf16>,
      %24 = vector.extract_strided_slice %21 {offsets = [1, 0], sizes = [16, 16], strides = [1, 1]} : vector<19x16xbf16> to vector<16x16xbf16>
      %c0_21 = arith.constant 0 : index
      %c80 = arith.constant 80 : index
      %25 = vector.load %arg6[%c0_21, %c80] : memref<16x256xbf16, #tpu.memory_space<vmem>>, vector<16x16xbf16>
      tpu.vector_store %arg6[%c0_21, %c80], %24 {strides = array<i32>} : memref<16x256xbf16, #tpu.memory_space<vmem>>, vector<16x16xbf16>,
      %26 = vector.extract_strided_slice %21 {offsets = [2, 0], sizes = [16, 16], strides = [1, 1]} : vector<19x16xbf16> to vector<16x16xbf16>
      %c0_22 = arith.constant 0 : index
      %c96 = arith.constant 96 : index
      %27 = vector.load %arg6[%c0_22, %c96] : memref<16x256xbf16, #tpu.memory_space<vmem>>, vector<16x16xbf16>
      tpu.vector_store %arg6[%c0_22, %c96], %26 {strides = array<i32>} : memref<16x256xbf16, #tpu.memory_space<vmem>>, vector<16x16xbf16>,
      %28 = vector.extract_strided_slice %21 {offsets = [3, 0], sizes = [16, 16], strides = [1, 1]} : vector<19x16xbf16> to vector<16x16xbf16>
      %c0_23 = arith.constant 0 : index
      %c112 = arith.constant 112 : index
      %29 = vector.load %arg6[%c0_23, %c112] : memref<16x256xbf16, #tpu.memory_space<vmem>>, vector<16x16xbf16>
      tpu.vector_store %arg6[%c0_23, %c112], %28 {strides = array<i32>} : memref<16x256xbf16, #tpu.memory_space<vmem>>, vector<16x16xbf16>,
      %c2_i32 = arith.constant 2 : i32
      %30 = arith.addi %arg7, %c2_i32 : i32
      %c0_24 = arith.constant 0 : index
      %c0_25 = arith.constant 0 : index
      %31 = arith.index_cast %30 : i32 to index
      %c0_26 = arith.constant 0 : index
      %c0_27 = arith.constant 0 : index
      %32 = vector.load %arg2[%c0_24, %c0_25, %31, %c0_26, %c0_27] : memref<1x1x19x19x16xbf16, #tpu.memory_space<vmem>>, vector<1x1x1x19x16xbf16>
      %33 = vector.shape_cast %32 : vector<1x1x1x19x16xbf16> to vector<19x16xbf16>
      %34 = vector.extract_strided_slice %33 {offsets = [0, 0], sizes = [16, 16], strides = [1, 1]} : vector<19x16xbf16> to vector<16x16xbf16>
      %c0_28 = arith.constant 0 : index
      %c128 = arith.constant 128 : index
      %35 = vector.load %arg6[%c0_28, %c128] : memref<16x256xbf16, #tpu.memory_space<vmem>>, vector<16x16xbf16>
      tpu.vector_store %arg6[%c0_28, %c128], %34 {strides = array<i32>} : memref<16x256xbf16, #tpu.memory_space<vmem>>, vector<16x16xbf16>,
      %36 = vector.extract_strided_slice %33 {offsets = [1, 0], sizes = [16, 16], strides = [1, 1]} : vector<19x16xbf16> to vector<16x16xbf16>
      %c0_29 = arith.constant 0 : index
      %c144 = arith.constant 144 : index
      %37 = vector.load %arg6[%c0_29, %c144] : memref<16x256xbf16, #tpu.memory_space<vmem>>, vector<16x16xbf16>
      tpu.vector_store %arg6[%c0_29, %c144], %36 {strides = array<i32>} : memref<16x256xbf16, #tpu.memory_space<vmem>>, vector<16x16xbf16>,
      %38 = vector.extract_strided_slice %33 {offsets = [2, 0], sizes = [16, 16], strides = [1, 1]} : vector<19x16xbf16> to vector<16x16xbf16>
      %c0_30 = arith.constant 0 : index
      %c160 = arith.constant 160 : index
      %39 = vector.load %arg6[%c0_30, %c160] : memref<16x256xbf16, #tpu.memory_space<vmem>>, vector<16x16xbf16>
      tpu.vector_store %arg6[%c0_30, %c160], %38 {strides = array<i32>} : memref<16x256xbf16, #tpu.memory_space<vmem>>, vector<16x16xbf16>,
      %40 = vector.extract_strided_slice %33 {offsets = [3, 0], sizes = [16, 16], strides = [1, 1]} : vector<19x16xbf16> to vector<16x16xbf16>
      %c0_31 = arith.constant 0 : index
      %c176 = arith.constant 176 : index
      %41 = vector.load %arg6[%c0_31, %c176] : memref<16x256xbf16, #tpu.memory_space<vmem>>, vector<16x16xbf16>
      tpu.vector_store %arg6[%c0_31, %c176], %40 {strides = array<i32>} : memref<16x256xbf16, #tpu.memory_space<vmem>>, vector<16x16xbf16>,
      %c3_i32 = arith.constant 3 : i32
      %42 = arith.addi %arg7, %c3_i32 : i32
      %c0_32 = arith.constant 0 : index
      %c0_33 = arith.constant 0 : index
      %43 = arith.index_cast %42 : i32 to index
      %c0_34 = arith.constant 0 : index
      %c0_35 = arith.constant 0 : index
      %44 = vector.load %arg2[%c0_32, %c0_33, %43, %c0_34, %c0_35] : memref<1x1x19x19x16xbf16, #tpu.memory_space<vmem>>, vector<1x1x1x19x16xbf16>
      %45 = vector.shape_cast %44 : vector<1x1x1x19x16xbf16> to vector<19x16xbf16>
      %46 = vector.extract_strided_slice %45 {offsets = [0, 0], sizes = [16, 16], strides = [1, 1]} : vector<19x16xbf16> to vector<16x16xbf16>
      %c0_36 = arith.constant 0 : index
      %c192 = arith.constant 192 : index
      %47 = vector.load %arg6[%c0_36, %c192] : memref<16x256xbf16, #tpu.memory_space<vmem>>, vector<16x16xbf16>
      tpu.vector_store %arg6[%c0_36, %c192], %46 {strides = array<i32>} : memref<16x256xbf16, #tpu.memory_space<vmem>>, vector<16x16xbf16>,
      %48 = vector.extract_strided_slice %45 {offsets = [1, 0], sizes = [16, 16], strides = [1, 1]} : vector<19x16xbf16> to vector<16x16xbf16>
      %c0_37 = arith.constant 0 : index
      %c208 = arith.constant 208 : index
      %49 = vector.load %arg6[%c0_37, %c208] : memref<16x256xbf16, #tpu.memory_space<vmem>>, vector<16x16xbf16>
      tpu.vector_store %arg6[%c0_37, %c208], %48 {strides = array<i32>} : memref<16x256xbf16, #tpu.memory_space<vmem>>, vector<16x16xbf16>,
      %50 = vector.extract_strided_slice %45 {offsets = [2, 0], sizes = [16, 16], strides = [1, 1]} : vector<19x16xbf16> to vector<16x16xbf16>
      %c0_38 = arith.constant 0 : index
      %c224 = arith.constant 224 : index
      %51 = vector.load %arg6[%c0_38, %c224] : memref<16x256xbf16, #tpu.memory_space<vmem>>, vector<16x16xbf16>
      tpu.vector_store %arg6[%c0_38, %c224], %50 {strides = array<i32>} : memref<16x256xbf16, #tpu.memory_space<vmem>>, vector<16x16xbf16>,
      %52 = vector.extract_strided_slice %45 {offsets = [3, 0], sizes = [16, 16], strides = [1, 1]} : vector<19x16xbf16> to vector<16x16xbf16>
      %c0_39 = arith.constant 0 : index
      %c240 = arith.constant 240 : index
      %53 = vector.load %arg6[%c0_39, %c240] : memref<16x256xbf16, #tpu.memory_space<vmem>>, vector<16x16xbf16>
      tpu.vector_store %arg6[%c0_39, %c240], %52 {strides = array<i32>} : memref<16x256xbf16, #tpu.memory_space<vmem>>, vector<16x16xbf16>,
      %c0_40 = arith.constant 0 : index
      %c0_41 = arith.constant 0 : index
      %54 = vector.load %arg6[%c0_40, %c0_41] : memref<16x256xbf16, #tpu.memory_space<vmem>>, vector<16x256xbf16>
      %cst = arith.constant dense<0.000000e+00> : vector<16x64xf32>
      %55 = tpu.matmul %54, %3, %cst {dimension_numbers = #tpu.dot_dimension_numbers<[1], [0], [0], [1], [0, 0, 1, 1], [], []>} : vector<16x256xbf16>, vector<256x64xbf16>, vector<16x64xf32> -> vector<16x64xf32>
      %56 = vector.broadcast %4 : vector<1x64xf32> to vector<16x64xf32>
      %57 = arith.addf %55, %56 : vector<16x64xf32>
      %cst_42 = arith.constant 0.000000e+00 : f32
      %58 = vector.broadcast %cst_42 : f32 to vector<16x64xf32>
      %59 = arith.maximumf %57, %58 : vector<16x64xf32>
      %c16_i32_43 = arith.constant 16 : i32
      %60 = arith.muli %arg1, %c16_i32_43 : i32
      %61 = arith.addi %60, %arg7 : i32
      %c16_i32_44 = arith.constant 16 : i32
      %62 = arith.cmpi slt, %61, %c16_i32_44 : i32
      %63 = vector.broadcast %62 : i1 to vector<16x1xi1>
      %64 = arith.andi %63, %2 : vector<16x1xi1>
      %cst_45 = arith.constant 0.000000e+00 : f32
      %65 = vector.shape_cast %64 : vector<16x1xi1> to vector<16x1xi1>
      %66 = vector.broadcast %65 : vector<16x1xi1> to vector<16x64xi1>
      %67 = vector.broadcast %cst_45 : f32 to vector<16x64xf32>
      %68 = arith.select %66, %59, %67 : vector<16x64xi1>, vector<16x64xf32>
      %69 = arith.truncf %68 : vector<16x64xf32> to vector<16x64xbf16>
      %c0_46 = arith.constant 0 : index
      %70 = arith.index_cast %arg7 : i32 to index
      %c0_47 = arith.constant 0 : index
      %c0_48 = arith.constant 0 : index
      %71 = vector.load %arg5[%c0_46, %70, %c0_47, %c0_48] : memref<1x16x16x64xbf16, #tpu.memory_space<vmem>>, vector<1x1x16x64xbf16>
      %72 = vector.shape_cast %71 : vector<1x1x16x64xbf16> to vector<16x64xbf16>
      %73 = vector.shape_cast %69 : vector<16x64xbf16> to vector<1x1x16x64xbf16>
      tpu.vector_store %arg5[%c0_46, %70, %c0_47, %c0_48], %73 {strides = array<i32>} : memref<1x16x16x64xbf16, #tpu.memory_space<vmem>>, vector<1x1x16x64xbf16>,
    }
    %c16_i32_4 = arith.constant 16 : i32
    return
  }
  func.func @transform_0(%arg0: i32, %arg1: i32) -> (i32, i32, i32, i32, i32) {
    %c0_i32 = arith.constant 0 : i32
    %c0_i32_0 = arith.constant 0 : i32
    %c0_i32_1 = arith.constant 0 : i32
    %c0_i32_2 = arith.constant 0 : i32
    return %arg0, %arg1, %c0_i32, %c0_i32_0, %c0_i32_1 : i32, i32, i32, i32, i32
  }
  func.func @transform_1(%arg0: i32, %arg1: i32) -> (i32, i32) {
    %c0_i32 = arith.constant 0 : i32
    %c0_i32_0 = arith.constant 0 : i32
    %c0_i32_1 = arith.constant 0 : i32
    return %c0_i32, %c0_i32_0 : i32, i32
  }
  func.func @transform_2(%arg0: i32, %arg1: i32) -> (i32, i32) {
    %c0_i32 = arith.constant 0 : i32
    %c0_i32_0 = arith.constant 0 : i32
    %c0_i32_1 = arith.constant 0 : i32
    return %c0_i32, %c0_i32_0 : i32, i32
  }
  func.func @transform_3(%arg0: i32, %arg1: i32) -> (i32, i32, i32, i32) {
    %c0_i32 = arith.constant 0 : i32
    %c0_i32_0 = arith.constant 0 : i32
    %c0_i32_1 = arith.constant 0 : i32
    return %arg0, %arg1, %c0_i32, %c0_i32_0 : i32, i32, i32, i32
  }
}

module attributes {stable_mosaic.version = 11 : i64} {
  func.func @_maxpool_kernel(%arg0: i32, %arg1: i32, %arg2: memref<1x8x2x8x128xbf16, #tpu.memory_space<vmem>>, %arg3: memref<1x1x2x8x128xbf16, #tpu.memory_space<vmem>>, %arg4: memref<1x8x8x64xbf16, #tpu.memory_space<vmem>>) attributes {dimension_semantics = [#tpu.dimension_semantics<parallel>, #tpu.dimension_semantics<parallel>], iteration_bounds = array<i64: 2, 1>, scalar_prefetch = 0 : i64, scratch_operands = 0 : i64, tpu.core_type = #tpu.core_type<tc>, window_params = [{transform_indices = @transform_0, window_bounds = array<i64: 1, 8, 2, 8, 128>}, {transform_indices = @transform_1, window_bounds = array<i64: 1, 1, 2, 8, 128>}, {transform_indices = @transform_2, window_bounds = array<i64: 1, 8, 8, 64>}]} {
    %c0_i32 = arith.constant 0 : i32
    %c8_i32 = arith.constant 8 : i32
    %0 = arith.addi %c0_i32, %c8_i32 : i32
    %c1_i32 = arith.constant 1 : i32
    scf.for %arg5 = %c0_i32 to %0 step %c1_i32  : i32 {
      %c0 = arith.constant 0 : index
      %1 = arith.index_cast %arg5 : i32 to index
      %c0_1 = arith.constant 0 : index
      %c0_2 = arith.constant 0 : index
      %c0_3 = arith.constant 0 : index
      %2 = vector.load %arg2[%c0, %1, %c0_1, %c0_2, %c0_3] : memref<1x8x2x8x128xbf16, #tpu.memory_space<vmem>>, vector<1x1x1x8x128xbf16>
      %3 = vector.shape_cast %2 : vector<1x1x1x8x128xbf16> to vector<8x128xbf16>
      %c0_4 = arith.constant 0 : index
      %4 = arith.index_cast %arg5 : i32 to index
      %c1 = arith.constant 1 : index
      %c0_5 = arith.constant 0 : index
      %c0_6 = arith.constant 0 : index
      %5 = vector.load %arg2[%c0_4, %4, %c1, %c0_5, %c0_6] : memref<1x8x2x8x128xbf16, #tpu.memory_space<vmem>>, vector<1x1x1x8x128xbf16>
      %6 = vector.shape_cast %5 : vector<1x1x1x8x128xbf16> to vector<8x128xbf16>
      %c1_i32_7 = arith.constant 1 : i32
      %7 = arith.subi %arg5, %c1_i32_7 : i32
      %c0_i32_8 = arith.constant 0 : i32
      %8 = arith.maxsi %7, %c0_i32_8 : i32
      %c0_9 = arith.constant 0 : index
      %9 = arith.index_cast %8 : i32 to index
      %c1_10 = arith.constant 1 : index
      %c0_11 = arith.constant 0 : index
      %c0_12 = arith.constant 0 : index
      %10 = vector.load %arg2[%c0_9, %9, %c1_10, %c0_11, %c0_12] : memref<1x8x2x8x128xbf16, #tpu.memory_space<vmem>>, vector<1x1x1x8x128xbf16>
      %11 = vector.shape_cast %10 : vector<1x1x1x8x128xbf16> to vector<8x128xbf16>
      %c0_13 = arith.constant 0 : index
      %c0_14 = arith.constant 0 : index
      %c1_15 = arith.constant 1 : index
      %c0_16 = arith.constant 0 : index
      %c0_17 = arith.constant 0 : index
      %12 = vector.load %arg3[%c0_13, %c0_14, %c1_15, %c0_16, %c0_17] : memref<1x1x2x8x128xbf16, #tpu.memory_space<vmem>>, vector<1x1x1x8x128xbf16>
      %13 = vector.shape_cast %12 : vector<1x1x1x8x128xbf16> to vector<8x128xbf16>
      %c0_i32_18 = arith.constant 0 : i32
      %14 = arith.cmpi eq, %arg5, %c0_i32_18 : i32
      %c0_i32_19 = arith.constant 0 : i32
      %15 = arith.cmpi sgt, %arg1, %c0_i32_19 : i32
      %cst = arith.constant 0.000000e+00 : bf16
      %16 = vector.broadcast %cst : bf16 to vector<8x128xbf16>
      %17 = arith.select %15, %13, %16 : vector<8x128xbf16>
      %18 = arith.select %14, %17, %11 : vector<8x128xbf16>
      %19 = arith.maximumf %3, %6 : vector<8x128xbf16>
      %20 = arith.maximumf %19, %18 : vector<8x128xbf16>
      %21 = vector.extract_strided_slice %20 {offsets = [0, 0], sizes = [8, 64], strides = [1, 1]} : vector<8x128xbf16> to vector<8x64xbf16>
      %22 = vector.extract_strided_slice %20 {offsets = [0, 64], sizes = [8, 64], strides = [1, 1]} : vector<8x128xbf16> to vector<8x64xbf16>
      %23 = arith.maximumf %21, %22 : vector<8x64xbf16>
      %24 = vector.extract_strided_slice %23 {offsets = [0, 0], sizes = [1, 64], strides = [1, 1]} : vector<8x64xbf16> to vector<1x64xbf16>
      %c0_20 = arith.constant 0 : index
      %25 = arith.index_cast %arg5 : i32 to index
      %c0_21 = arith.constant 0 : index
      %c0_22 = arith.constant 0 : index
      %26 = vector.load %arg4[%c0_20, %25, %c0_21, %c0_22] : memref<1x8x8x64xbf16, #tpu.memory_space<vmem>>, vector<1x1x1x64xbf16>
      %27 = vector.shape_cast %26 : vector<1x1x1x64xbf16> to vector<1x64xbf16>
      %28 = vector.shape_cast %24 : vector<1x64xbf16> to vector<1x1x1x64xbf16>
      tpu.vector_store %arg4[%c0_20, %25, %c0_21, %c0_22], %28 {strides = array<i32>} : memref<1x8x8x64xbf16, #tpu.memory_space<vmem>>, vector<1x1x1x64xbf16>,
      %29 = vector.extract_strided_slice %20 {offsets = [0, 64], sizes = [8, 64], strides = [1, 1]} : vector<8x128xbf16> to vector<8x64xbf16>
      %30 = vector.extract_strided_slice %23 {offsets = [1, 0], sizes = [7, 64], strides = [1, 1]} : vector<8x64xbf16> to vector<7x64xbf16>
      %31 = vector.extract_strided_slice %29 {offsets = [0, 0], sizes = [7, 64], strides = [1, 1]} : vector<8x64xbf16> to vector<7x64xbf16>
      %32 = arith.maximumf %30, %31 : vector<7x64xbf16>
      %c0_23 = arith.constant 0 : index
      %33 = arith.index_cast %arg5 : i32 to index
      %c1_24 = arith.constant 1 : index
      %c0_25 = arith.constant 0 : index
      %34 = vector.load %arg4[%c0_23, %33, %c1_24, %c0_25] : memref<1x8x8x64xbf16, #tpu.memory_space<vmem>>, vector<1x1x7x64xbf16>
      %35 = vector.shape_cast %34 : vector<1x1x7x64xbf16> to vector<7x64xbf16>
      %36 = vector.shape_cast %32 : vector<7x64xbf16> to vector<1x1x7x64xbf16>
      tpu.vector_store %arg4[%c0_23, %33, %c1_24, %c0_25], %36 {strides = array<i32>} : memref<1x8x8x64xbf16, #tpu.memory_space<vmem>>, vector<1x1x7x64xbf16>,
    }
    %c8_i32_0 = arith.constant 8 : i32
    return
  }
  func.func @transform_0(%arg0: i32, %arg1: i32) -> (i32, i32, i32, i32, i32) {
    %c0_i32 = arith.constant 0 : i32
    %c0_i32_0 = arith.constant 0 : i32
    %c0_i32_1 = arith.constant 0 : i32
    %c0_i32_2 = arith.constant 0 : i32
    return %arg0, %arg1, %c0_i32, %c0_i32_0, %c0_i32_1 : i32, i32, i32, i32, i32
  }
  func.func @transform_1(%arg0: i32, %arg1: i32) -> (i32, i32, i32, i32, i32) {
    %c8_i32 = arith.constant 8 : i32
    %0 = arith.muli %arg1, %c8_i32 : i32
    %c1_i32 = arith.constant 1 : i32
    %1 = arith.subi %0, %c1_i32 : i32
    %c0_i32 = arith.constant 0 : i32
    %2 = arith.maxsi %1, %c0_i32 : i32
    %c0_i32_0 = arith.constant 0 : i32
    %c0_i32_1 = arith.constant 0 : i32
    %c0_i32_2 = arith.constant 0 : i32
    %c0_i32_3 = arith.constant 0 : i32
    return %arg0, %2, %c0_i32_0, %c0_i32_1, %c0_i32_2 : i32, i32, i32, i32, i32
  }
  func.func @transform_2(%arg0: i32, %arg1: i32) -> (i32, i32, i32, i32) {
    %c0_i32 = arith.constant 0 : i32
    %c0_i32_0 = arith.constant 0 : i32
    %c0_i32_1 = arith.constant 0 : i32
    return %arg0, %arg1, %c0_i32, %c0_i32_0 : i32, i32, i32, i32
  }
}

</mosaic_0001>

<bundles_post_ra>
// kernel: generalized_rcnn_inference.3
= control target key start
LH: loop header
LB: loop body
LE: loop exit
PB: predicated region body
PF: predicated region fallthrough
CT: control target
= control target key end

     0   :  { %s554_s9 = smov 0   ;;  %s556_s10 = smov 0   ;;  %s606_s0 = inlined_call_operand.vmem [shape: bf16[2,8,2,8,128], index: 0, kind: input, shape index: {}, may-alias: {0,1}]   ;;  %s607_s1 = inlined_call_operand.vmem [shape: bf16[2,8,2,8,128], index: 1, kind: input, shape index: {}, may-alias: {0,1}]   ;;  %s608_s2 = inlined_call_operand.vmem [shape: bf16[2,8,8,64], index: 2, kind: output, shape index: {}]  }
   0x1   :  { %s558_s11 = smov 0  }
   0x2 LB: > { %s24_s1 = sadd.s32 1, %s528_s10  ;;  %p447_p0 = scmp.ge.s32.totalorder %s532_s11, 1  ;;  %s532_s11 = sphi %s558_s11, %s12_s11   ;;  %s528_s10 = sphi %s556_s10, %s610_s10   ;;  %s524_s9 = sphi %s554_s9, %s609_s9  }
   0x3   : > { %p26_p1 = scmp.ge.s32.totalorder %s24_s1, 2  ;;  %p166_p2 = scmp.lt.s32.totalorder %s532_s11, 3 }
   0x5   : > { %s612_s1 = smov (%p26_p1, %s24_s1), 0  ;;  %p167_p3 = pnand %p447_p0, %p166_p2 }
   0x6   : > { %p211_p4 = scmp.lt.s32.totalorder (!%p167_p3), %s524_s9, 1  ;;  %s582_s20 = smov (!%p167_p3), 0  }
   0x7   : > { %170 = sbr.rel (%p167_p3) target bundleno = 154 (0x9a), region = 28 }
   0xc   : > { %s614_s9 = smov (!%p211_p4, %s524_s9), 1 }
   0xd   : > { %s467_s12 = sshll.u32 %s614_s9, 6  ;;  %s469_s13 = sshll.u32 %s614_s9, 5 }
   0xe   : > { %s575_s16 = scalar_lea.vmem %s606_s0, %s467_s12  ;;  %s580_s19 = scalar_lea.vmem %s608_s2, %s469_s13 }
   0xf LB: >> { %s470_s21 = sshll.u32 %s536_s20, 3  ;;  %s459_s22 = sadd.s32 4294967295, %s536_s20  ;;  %vm292_vm1 = vcmask 516096   ;;  %vm293_vm2 = vsmask.f32 256  ;;  %vm309_vm4 = vcmask 519168   ;;  %s536_s20 = sphi %s582_s20, %s254_s20  }
  0x10   : >> { %s257_s23 = scalar_lea.vmem %s575_s16, %s470_s21  ;;  %p264_p5 = scmp.gt.s32.totalorder %s459_s22, 0  ;;  %vm294_vm3 = vmand %vm292_vm1, %vm293_vm2  ;;  %vm310_vm5 = vsmask.f32 7938 }
  0x11   : >> { %v258_v0 = vld [vmem:[%s257_s23] sm:$0xf]  ;;  %v458_v1 = vld [vmem:[%s257_s23 + $0x4] sm:$0xf]  ;;  %p273_p6 = scmp.eq.s32.totalorder %s536_s20, 0  ;;  %s538_s27 = smov 64   ;;  %vm311_vm6 = vmand %vm309_vm4, %vm310_vm5 }
  0x12   : >> { %s616_s22 = smov (!%p264_p5, %s459_s22), 0  ;;  %v283_v2 = vmax.bf16 %v458_v1, %v258_v0  ;;  %s464_s28 = sshll.u32 %s536_s20, 2 }
  0x13   : >> { %s279_s24 = scalar_select %p273_p6, 1, 0 }
  0x14   : >> { %s472_s25 = sshll.u32 %s616_s22, 3  ;;  %s291_s29 = scalar_lea.vmem %s580_s19, %s464_s28 }
  0x15   : >> { %s391_s26 = scalar_lea.vmem %s575_s16, %s472_s25  ;;  %v280_v3 = vstv %s279_s24  ;;  %v295_v11 = vld [vmem:[%s291_s29] sm:$0x1]  ;;  %s254_s20 = sadd.s32 1, %s536_s20  }
  0x16   : >> { %v462_v4 = vld [vmem:[%s391_s26 + $0x4] sm:$0xf]  ;;  %vm281_vm0 = vcmp.eq.s32.totalorder %v280_v3, 1  ;;  %p251_p7 = scmp.ge.s32.totalorder %s254_s20, 8  }
  0x17   : >> { %v282_v5 = vsel %vm281_vm0, 0, %v462_v4 }
  0x18   : >> { %v284_v6 = vmax.bf16 %v283_v2, %v282_v5 }
  0x1a   : >> { %286 = vrot.lane.b32.xlu0 %v284_v6, %s538_s27  ;;  %v299_v7 = vshrl.u32 %v284_v6, 16  ;;  %v302_v8 = vshll.u32 %v284_v6, 16 }
  0x1c   : >> { %v301_v9 = vrot.slane %v299_v7, 7 }
  0x1e   : >> { %v304_v10 = vor.u32 %v302_v8, %v301_v9 }
  0x20   : >> { %305 = vrot.lane.b32.xlu0 %v304_v10, %s538_s27 }
  0x8c   : >> { %v287_v12 = vpop.permute.xlu0 %286 }
  0x8d   : >> { %v289_v13 = vmax.bf16 %v287_v12, %v284_v6 }
  0x8f   : >> { %v296_v14 = vsel %vm294_vm3, %v289_v13, %v295_v11 }
  0x90   : >> { %297 = vst [vmem:[%s291_s29] sm:$0x1] %v296_v14 }
  0x92   : >> { %v306_v15 = vpop.permute.xlu0 %305 }
  0x93   : >> { %v308_v16 = vmax.bf16 %v306_v15, %v289_v13 }
  0x95   : > { %253 = sbr.rel (!%p251_p7) target bundleno = 15 (0xf), region = 73 }
  0x97   : >> { %v312_v17 = vld [vmem:[%s291_s29] sm:$0xf] }
  0x98   : >> { %v313_v18 = vsel %vm311_vm6, %v308_v16, %v312_v17 }
  0x99   : >> { %314 = vst [vmem:[%s291_s29] sm:$0xf] %v313_v18 }
  0x9a PF: > { %s12_s11 = sadd.s32 1, %s532_s11   ;;  %s609_s9 = smov %s528_s10 }
  0x9b   : > { %p9_p8 = scmp.ge.s32.totalorder %s12_s11, 4   ;;  %s610_s10 = smov %s612_s1 }
  0x9d   :  { %11 = sbr.rel (!%p9_p8) target bundleno = 2 (0x2), region = 84 }

// kernel: generalized_rcnn_inference.2
= control target key start
LH: loop header
LB: loop body
LE: loop exit
PB: predicated region body
PF: predicated region fallthrough
CT: control target
= control target key end

     0   :  { %s1086_s12 = smov 0   ;;  %s1088_s13 = smov 0   ;;  %s1484_s0 = inlined_call_operand.vmem [shape: bf16[2,1,19,19,16], index: 0, kind: input, shape index: {}]   ;;  %s1485_s1 = inlined_call_operand.vmem [shape: bf16[256,64], index: 1, kind: input, shape index: {}]   ;;  %s1486_s2 = inlined_call_operand.vmem [shape: f32[1,64], index: 2, kind: input, shape index: {}]   ;;  %s1487_s3 = inlined_call_operand.vmem [shape: bf16[2,16,16,64], index: 3, kind: output, shape index: {}]  }
   0x1   :  { %s1090_s14 = smov 0  }
   0x2 LB: > { %s25_s15 = sadd.s32 1, %s1049_s13  ;;  %p914_p0 = scmp.ge.s32.totalorder %s1053_s14, 1  ;;  %s1053_s14 = sphi %s1090_s14, %s13_s14   ;;  %s1049_s13 = sphi %s1088_s13, %s1508_s13   ;;  %s1045_s12 = sphi %s1086_s12, %s1507_s12  }
   0x3   : > { %p27_p1 = scmp.ge.s32.totalorder %s25_s15, 2  ;;  %p157_p2 = scmp.lt.s32.totalorder %s1053_s14, 3 }
   0x5   : > { %s1510_s15 = smov (%p27_p1, %s25_s15), 0  ;;  %p158_p3 = pnand %p914_p0, %p157_p2 }
   0x6   : > { %p190_p4 = scmp.lt.s32.totalorder (!%p158_p3), %s1045_s12, 1  ;;  %s1279_s22 = smov (!%p158_p3), 0  }
   0x7   : > { %161 = sbr.rel (%p158_p3) target bundleno = 420 (0x1a4), region = 32 }
   0xc   : > { %v1107_v0 = vld [vmem:[%s1485_s1] sm:$0xf]  ;;  %v1112_v1 = vld [vmem:[%s1485_s1 + $0x4] sm:$0xf]  ;;  %v1117_v2 = vld [vmem:[%s1485_s1 + $0x8] sm:$0xf] }
   0xd   : > { %1492 = vst [vmem:[#allocation3_spill] sm:$0xff] %v1107_v0  ;;  %1493 = vst [vmem:[#allocation4_spill] sm:$0xff] %v1112_v1  ;;  %v1122_v3 = vld [vmem:[%s1485_s1 + $0xc] sm:$0xf]  ;;  %v1127_v4 = vld [vmem:[%s1485_s1 + $0x10] sm:$0xf] }
   0xe   : > { %s1512_s12 = smov (!%p190_p4, %s1045_s12), 1  ;;  %v1132_v5 = vld [vmem:[%s1485_s1 + $0x14] sm:$0xf]  ;;  %v1137_v6 = vld [vmem:[%s1485_s1 + $0x18] sm:$0xf] }
   0xf   : > { %v1142_v7 = vld [vmem:[%s1485_s1 + $0x1c] sm:$0xf]  ;;  %v1147_v8 = vld [vmem:[%s1485_s1 + $0x20] sm:$0xf]  ;;  %v1152_v9 = vld [vmem:[%s1485_s1 + $0x24] sm:$0xf] }
  0x10   : > { %s984_s9 = smul.u32 228, %s1512_s12  ;;  %s957_s10 = sshll.u32 %s1512_s12, 7  ;;  %v1157_v10 = vld [vmem:[%s1485_s1 + $0x28] sm:$0xf]  ;;  %v1162_v11 = vld [vmem:[%s1485_s1 + $0x2c] sm:$0xf] }
  0x11   : > { %s1167_s21 = scalar_lea.vmem %s1487_s3, %s957_s10  ;;  %v1172_v12 = vld [vmem:[%s1485_s1 + $0x30] sm:$0xf]  ;;  %v1177_v13 = vld [vmem:[%s1485_s1 + $0x34] sm:$0xf]  ;;  %v1182_v14 = vld [vmem:[%s1485_s1 + $0x38] sm:$0xf] }
  0x12   : > { %s1187_s29 = scalar_lea.vmem %s1484_s0, %s984_s9  ;;  %v1192_v15 = vld [vmem:[%s1485_s1 + $0x3c] sm:$0xf]  ;;  %v1197_v16 = vld [vmem:[%s1485_s1 + $0x40] sm:$0xf]  ;;  %v1202_v17 = vld [vmem:[%s1485_s1 + $0x44] sm:$0xf] }
  0x13   : > { %v1207_v18 = vld [vmem:[%s1485_s1 + $0x48] sm:$0xf]  ;;  %v1212_v19 = vld [vmem:[%s1485_s1 + $0x4c] sm:$0xf]  ;;  %v1217_v20 = vld [vmem:[%s1485_s1 + $0x50] sm:$0xf] }
  0x14   : > { %v1222_v21 = vld [vmem:[%s1485_s1 + $0x54] sm:$0xf]  ;;  %v1227_v22 = vld [vmem:[%s1485_s1 + $0x58] sm:$0xf]  ;;  %v1232_v23 = vld [vmem:[%s1485_s1 + $0x5c] sm:$0xf] }
  0x15   : > { %v1237_v24 = vld [vmem:[%s1485_s1 + $0x60] sm:$0xf]  ;;  %v1242_v25 = vld [vmem:[%s1485_s1 + $0x64] sm:$0xf]  ;;  %v1247_v26 = vld [vmem:[%s1485_s1 + $0x68] sm:$0xf] }
  0x16   : > { %v1252_v27 = vld [vmem:[%s1485_s1 + $0x6c] sm:$0xf]  ;;  %v1257_v28 = vld [vmem:[%s1485_s1 + $0x70] sm:$0xf]  ;;  %v1262_v29 = vld [vmem:[%s1485_s1 + $0x74] sm:$0xf] }
  0x17   : > { %v1267_v30 = vld [vmem:[%s1485_s1 + $0x78] sm:$0xf]  ;;  %v1272_v31 = vld [vmem:[%s1485_s1 + $0x7c] sm:$0xf]  ;;  %v1277_v32 = vld [vmem:[%s1486_s2] ss:$0 sm:$0xff] }
  0x18   : > { %1494 = vst [vmem:[#allocation5_spill] sm:$0xff] %v1277_v32 }
  0x19 LB: >> { %vm303_vm0 = vcmask 1042432   ;;  %vm304_vm1 = vcmask 1046532   ;;  %s958_s23 = smul.u32 12, %s1057_s22  ;;  %vm261_vm2 = vcmask 125952   ;;  %vm264_vm4 = vsmask.f32 3328  ;;  %s1057_s22 = sphi %s1279_s22, %s254_s22  }
  0x1a   : >> { %vm1288_vm3 = vmor %vm303_vm0, %vm304_vm1  ;;  %vm265_vm5 = vsmask.f32 7440  ;;  %vm322_vm6 = vsmask.f32 2304  ;;  %vm323_vm7 = vsmask.f32 6416 }
  0x1b   : >> { %s1286_s12 = scalar_lea.vmem %s1187_s29, %s958_s23  ;;  %s1059_s24 = smov 32   ;;  %vm1329_vm8 = vmor %vm264_vm4, %vm265_vm5  ;;  %vm297_vm10 = vcmask 257152   ;;  %vm319_vm11 = vcmask 388352   ;;  %vm346_vm12 = vcmask 519552   ;;  %vm364_vm13 = vcmask 650752  }
  0x1c   : >> { %v258_v34 = vld [vmem:[%s1286_s12] sm:$0xf]  ;;  %v259_v35 = vld [vmem:[%s1286_s12 + $0x4] sm:$0xf]  ;;  %v1295_v36 = vld [vmem:[%s1286_s12 + $0x8] sm:$0x3] }
  0x1d   : >> { %v919_v37 = vrot.slane %v258_v34, 9  ;;  %v308_v38 = vrot.slane %v259_v35, 5  ;;  %v311_v39 = vrot.slane %v1295_v36, 5  ;;  %v1299_v40 = vld [vmem:[%s1286_s12 + $0x18] sm:$0xf]  ;;  %v268_v41 = vshrl.u32 %v258_v34, 16  ;;  %vm1344_vm9 = vmor %vm322_vm6, %vm323_vm7 }
  0x1e   : >> { %262 = vst.msk [vmem:[#allocation2] sm:$0xf] %vm261_vm2, %v258_v34  ;;  %263 = vst.msk [vmem:[#allocation2 + $0x8] sm:$0xf] %vm261_vm2, %v259_v35  ;;  %v1304_v42 = vld [vmem:[%s1286_s12 + $0x1c] sm:$0xf] }
  0x1f   : >> { %v927_v43 = vrot.slane %v1299_v40, 9  ;;  %v1308_v44 = vld [vmem:[%s1286_s12 + $0x20] sm:$0x3]  ;;  %v271_v45 = vshll.u32 %v258_v34, 16  ;;  %448 = vst.msk [vmem:[#allocation2 + $0x4] sm:$0xf] %vm261_vm2, %v1299_v40  ;;  %v309_v46 = vsel %vm1288_vm3, %v919_v37, %v308_v38 }
  0x20   : >> { %v310_v47 = vrot.slane %v308_v38, 4  ;;  %v487_v48 = vrot.slane %v1304_v42, 5  ;;  %v490_v49 = vrot.slane %v1308_v44, 5  ;;  %449 = vst.msk [vmem:[#allocation2 + $0xc] sm:$0xf] %vm261_vm2, %v1304_v42  ;;  %313 = vrot.lane.b32.xlu0 %v309_v46, %s1059_s24  ;;  %v270_v50 = vrot.slane %v268_v41, 4 }
  0x21   : >> { %v273_v51 = vrot.slane %v271_v45, 5  ;;  %v277_v52 = vshll.u32 %v259_v35, 16  ;;  %v451_v53 = vshrl.u32 %v1299_v40, 16  ;;  %v454_v57 = vshll.u32 %v1299_v40, 16  ;;  %s1060_s25 = smov 16   ;;  %s1061_s26 = smov 48  }
  0x22   : >> { %v312_v54 = vsel %vm1288_vm3, %v310_v47, %v311_v39  ;;  %v488_v55 = vsel %vm1288_vm3, %v927_v43, %v487_v48  ;;  %v489_v56 = vrot.slane %v487_v48, 4  ;;  %v460_v61 = vshll.u32 %v1304_v42, 16  ;;  %s1062_s27 = smov 64   ;;  %s1063_s28 = smov 80  }
  0x23   : >> { %315 = vrot.lane.b32.xlu1 %v312_v54, %s1059_s24  ;;  %v274_v58 = vor.u32 %v273_v51, %v270_v50  ;;  %v279_v59 = vrot.slane %v277_v52, 5  ;;  %v453_v60 = vrot.slane %v451_v53, 4  ;;  %v456_v34 = vrot.slane %v454_v57, 5  ;;  %s1064_s30 = smov 96   ;;  %s1065_s4 = smov 112  }
  0x24   : >> { %v491_v62 = vsel %vm1288_vm3, %v489_v56, %v490_v49  ;;  %v281_v37 = vshrl.u32 %v259_v35, 16  ;;  %v287_v38 = vshll.u32 %v1295_v36, 16  ;;  %492 = vrot.lane.b32.xlu0 %v488_v55, %s1059_s24  ;;  %v462_v40 = vrot.slane %v460_v61, 5  ;;  %p770_p5 = scmp.lt.s32.totalorder %s1057_s22, 16  ;;  %s961_s6 = sshll.u32 %s1057_s22, 3 }
  0x25   : >> { %v275_v39 = vrot.slane %v274_v58, 4  ;;  %v464_v43 = vshrl.u32 %v1304_v42, 16  ;;  %v470_v46 = vshll.u32 %v1308_v44, 16  ;;  %v457_v47 = vor.u32 %v456_v34, %v453_v60  ;;  %s792_s7 = scalar_lea.vmem %s1167_s21, %s961_s6  ;;  %s254_s22 = sadd.s32 1, %s1057_s22  }
  0x26   : >> { %v283_v48 = vrot.slane %v281_v37, 4  ;;  %v289_v49 = vrot.slane %v287_v38, 5  ;;  %v325_v50 = vrot.slane %v268_v41, 5  ;;  %v326_v35 = vrot.slane %v271_v45, 6  ;;  %v1504_v45 = vld [vmem:[#allocation4_spill] sm:$0xff]  ;;  %p251_p6 = scmp.ge.s32.totalorder %s254_s22, 16  }
  0x27   : >> { %494 = vrot.lane.b32.xlu1 %v491_v62, %s1059_s24  ;;  %v280_v51 = vsel %vm1329_vm8, %v275_v39, %v279_v59  ;;  %v466_v54 = vrot.slane %v464_v43, 4  ;;  %v472_v56 = vrot.slane %v470_v46, 5  ;;  %v458_v32 = vrot.slane %v457_v47, 4  ;;  %s771_s5 = scalar_select %p770_p5, 1, 0 }
  0x28   : >> { %v284_v0 = vor.u32 %v283_v48, %v279_v59  ;;  %v329_v55 = vrot.slane %v281_v37, 5  ;;  %v330_v58 = vrot.slane %v277_v52, 6  ;;  %291 = vrot.lane.b32.xlu0 %v280_v51, %s1060_s25  ;;  %v327_v60 = vor.u32 %v326_v35, %v325_v50  ;;  %v1360_v35 = vld [vmem:[%s1286_s12 + $0x10] sm:$0xf] }
  0x29   : >> { %v467_v42 = vor.u32 %v466_v54, %v462_v40  ;;  %v334_v34 = vshrl.u32 %v1295_v36, 16  ;;  %v337_v41 = vrot.slane %v287_v38, 6  ;;  %v463_v62 = vsel %vm1329_vm8, %v458_v32, %v462_v40  ;;  %v1350_v38 = vld [vmem:[%s1286_s12 + $0xc] sm:$0xf] }
  0x2a   : >> { %v285_v39 = vrot.slane %v284_v0, 4  ;;  %v331_v52 = vor.u32 %v330_v58, %v329_v55  ;;  %v500_v59 = vrot.slane %v451_v53, 5  ;;  %v328_v47 = vrot.slane %v327_v60, 4 }
  0x2b   : >> { %474 = vrot.lane.b32.xlu1 %v463_v62, %s1060_s25  ;;  %v468_v37 = vrot.slane %v467_v42, 4  ;;  %v336_v48 = vrot.slane %v334_v34, 5  ;;  %v501_v36 = vrot.slane %v454_v57, 6  ;;  %v504_v40 = vrot.slane %v464_v43, 5 }
  0x2c   : >> { %v290_v0 = vsel %vm1329_vm8, %v285_v39, %v289_v49  ;;  %v333_v32 = vrot.slane %v331_v52, 4  ;;  %v505_v50 = vrot.slane %v460_v61, 6  ;;  %v332_v51 = vsel %vm1344_vm9, %v328_v47, %v331_v52  ;;  %v1365_v61 = vld [vmem:[%s1286_s12 + $0x24] sm:$0xf] }
  0x2d   : >> { %293 = vrot.lane.b32.xlu0 %v290_v0, %s1060_s25  ;;  %v473_v53 = vsel %vm1329_vm8, %v468_v37, %v472_v56  ;;  %v338_v54 = vor.u32 %v337_v41, %v336_v48  ;;  %v502_v57 = vor.u32 %v501_v36, %v500_v59  ;;  %v509_v58 = vshrl.u32 %v1308_v44, 16  ;;  %v1374_v44 = vld [vmem:[%s1286_s12 + $0x28] sm:$0xf] }
  0x2e   : >> { %v506_v55 = vor.u32 %v505_v50, %v504_v40  ;;  %v512_v49 = vrot.slane %v470_v46, 6  ;;  %v368_v43 = vshrl.u32 %v1350_v38, 16  ;;  %v371_v60 = vshll.u32 %v1350_v38, 16 }
  0x2f   : >> { %476 = vrot.lane.b32.xlu1 %v473_v53, %s1060_s25  ;;  %v339_v56 = vsel %vm1344_vm9, %v333_v32, %v338_v54  ;;  %v503_v42 = vrot.slane %v502_v57, 4  ;;  %v511_v41 = vrot.slane %v509_v58, 5  ;;  %v377_v62 = vshll.u32 %v1360_v35, 16  ;;  %v922_v53 = vld [vmem:[%s1286_s12 + $0x14] sm:$0x3] }
  0x30   : >> { %v508_v34 = vrot.slane %v506_v55, 4  ;;  %v381_v39 = vshrl.u32 %v1360_v35, 16  ;;  %v1491_v52 = vshrl.u32 %v1365_v61, 16  ;;  %v544_v37 = vshll.u32 %v1365_v61, 16 }
  0x31   : >> { %340 = vrot.lane.b32.xlu0 %v332_v51, %s1061_s26  ;;  %v507_v46 = vsel %vm1344_vm9, %v503_v42, %v506_v55  ;;  %v513_v59 = vor.u32 %v512_v49, %v511_v41  ;;  %v370_v47 = vrot.slane %v368_v43, 4  ;;  %v373_v48 = vrot.slane %v371_v60, 5  ;;  %v1393_v42 = vld [vmem:[%s1286_s12 + $0x2c] sm:$0x3] }
  0x32   : >> { %v1489_v36 = vshll.u32 %v1374_v44, 16  ;;  %v1490_v32 = vshrl.u32 %v1374_v44, 16  ;;  %v379_v40 = vrot.slane %v377_v62, 5  ;;  %v383_v50 = vrot.slane %v381_v39, 4 }
  0x33   : >> { %342 = vrot.lane.b32.xlu1 %v339_v56, %s1061_s26  ;;  %v514_v0 = vsel %vm1344_vm9, %v508_v34, %v513_v59  ;;  %v374_v51 = vor.u32 %v373_v48, %v370_v47  ;;  %v543_v54 = vrot.slane %v1491_v52, 4  ;;  %v546_v57 = vrot.slane %v544_v37, 5 }
  0x34   : >> { %v384_v55 = vor.u32 %v383_v50, %v379_v40  ;;  %v387_v58 = vshll.u32 %v922_v53, 16  ;;  %v552_v49 = vrot.slane %v1489_v36, 5  ;;  %v556_v56 = vrot.slane %v1490_v32, 4 }
  0x35   : >> { %515 = vrot.lane.b32.xlu0 %v507_v46, %s1061_s26  ;;  %v375_v34 = vrot.slane %v374_v51, 4  ;;  %v547_v41 = vor.u32 %v546_v57, %v543_v54  ;;  %v560_v48 = vshll.u32 %v1393_v42, 16  ;;  %v406_v32 = vrot.slane %v922_v53, 5 }
  0x36   : >> { %v385_v46 = vrot.slane %v384_v55, 4  ;;  %v389_v59 = vrot.slane %v387_v58, 5  ;;  %v557_v47 = vor.u32 %v556_v56, %v552_v49  ;;  %v923_v55 = vrot.slane %v1350_v38, 9 }
  0x37   : >> { %517 = vrot.lane.b32.xlu1 %v514_v0, %s1061_s26  ;;  %v403_v0 = vrot.slane %v1360_v35, 5  ;;  %v380_v50 = vsel %vm1329_vm8, %v375_v34, %v379_v40  ;;  %v548_v36 = vrot.slane %v547_v41, 4  ;;  %v562_v57 = vrot.slane %v560_v48, 5 }
  0x38   : >> { %v390_v51 = vsel %vm1329_vm8, %v385_v46, %v389_v59  ;;  %v558_v54 = vrot.slane %v557_v47, 4  ;;  %v417_v52 = vrot.slane %v368_v43, 5  ;;  %v418_v1 = vrot.slane %v371_v60, 6 }
  0x39   : >> { %358 = vrot.lane.b32.xlu0 %v1350_v38, %s1062_s27  ;;  %v405_v56 = vrot.slane %v403_v0, 4  ;;  %v950_v40 = vcombine.low %v1267_v30, %v1272_v31  ;;  %v575_v34 = vrot.slane %v1374_v44, 5  ;;  %v942_v41 = vcombine.low %v1182_v14, %v1192_v15 }
  0x3a   : >> { %v949_v46 = vcombine.low %v1257_v28, %v1262_v29  ;;  %v563_v38 = vsel %vm1329_vm8, %v558_v54, %v562_v57  ;;  %v421_v59 = vrot.slane %v381_v39, 5  ;;  %v422_v47 = vrot.slane %v377_v62, 6 }
  0x3b   : >> { %360 = vrot.lane.b32.xlu1 %v1360_v35, %s1062_s27  ;;  %v553_v35 = vsel %vm1329_vm8, %v548_v36, %v552_v49  ;;  %v426_v36 = vshrl.u32 %v922_v53, 16  ;;  %962 = vmatprep.subr.bf16.mxu0 %v950_v40  ;;  %v404_v43 = vsel %vm1288_vm3, %v923_v55, %v403_v0  ;;  %v407_v60 = vsel %vm1288_vm3, %v405_v56, %v406_v32 }
  0x3c   : >> { %v931_v49 = vrot.slane %v1365_v61, 9  ;;  %963 = vmatpush3.bf16.msra.mxu0 %v942_v41  ;;  %v1501_v63 = vshrl.u32 %v1365_v61, 16  ;;  %v589_v62 = vrot.slane %v544_v37, 6  ;;  %v948_v53 = vcombine.low %v1247_v26, %v1252_v27 }
  0x3d   : >> { %532 = vrot.lane.b32.xlu0 %v1365_v61, %s1062_s27  ;;  %964 = vmatprep.subr.bf16.mxu0 %v949_v46  ;;  %v577_v0 = vrot.slane %v575_v34, 4  ;;  %v578_v54 = vrot.slane %v1393_v42, 5  ;;  %v429_v32 = vrot.slane %v387_v58, 6  ;;  %v1502_v57 = vshrl.u32 %v1374_v44, 16 }
  0x3e   : >> { %v588_v39 = vrot.slane %v1501_v63, 5  ;;  %v423_v56 = vor.u32 %v422_v47, %v421_v59  ;;  %v597_v61 = vshrl.u32 %v1393_v42, 16  ;;  %v940_v37 = vcombine.low %v1157_v10, %v1162_v11 }
  0x3f   : >> { %534 = vrot.lane.b32.xlu1 %v1374_v44, %s1062_s27  ;;  %v592_v55 = vrot.slane %v1502_v57, 5  ;;  %v576_v40 = vsel %vm1288_vm3, %v931_v49, %v575_v34  ;;  %v947_v46 = vcombine.low %v1237_v24, %v1242_v25  ;;  %v600_v42 = vrot.slane %v560_v48, 6  ;;  %v1505_v57 = vld [vmem:[#allocation3_spill] sm:$0xff] }
  0x40   : >> { %v590_v41 = vor.u32 %v589_v62, %v588_v39  ;;  %v939_v34 = vcombine.low %v1147_v8, %v1152_v9  ;;  %v945_v39 = vcombine.low %v1217_v20, %v1222_v21  ;;  %vm397_vm14 = vcmask 781952  }
  0x41   : >> { %391 = vrot.lane.b32.xlu0 %v380_v50, %s1063_s28  ;;  %v941_v50 = vcombine.low %v1172_v12, %v1177_v13  ;;  %vm414_vm15 = vcmask 913152   ;;  %vm438_vm0 = vcmask 1044352   ;;  %vm793_vm2 = vcmask 519168  }
  0x42   : >> { %v591_v49 = vrot.slane %v590_v41, 4 }
  0x43   : >> { %393 = vrot.lane.b32.xlu1 %v390_v51, %s1063_s28  ;;  %v419_v51 = vor.u32 %v418_v1, %v417_v52  ;;  %v1503_v1 = vshll.u32 %v1374_v44, 16  ;;  %965 = vmatpush3.bf16.msra.mxu0 %v941_v50  ;;  %v579_v44 = vsel %vm1288_vm3, %v577_v0, %v578_v54  ;;  %v944_v0 = vcombine.low %v1207_v18, %v1212_v19 }
  0x44   : >> { %966 = vmatprep.subr.bf16.mxu0 %v948_v53  ;;  %v937_v53 = vcombine.low %v1127_v4, %v1132_v5  ;;  %v936_v54 = vcombine.low %v1117_v2, %v1122_v3 }
  0x45   : >> { %564 = vrot.lane.b32.xlu0 %v553_v35, %s1063_s28  ;;  %v428_v35 = vrot.slane %v426_v36, 5  ;;  %v593_v52 = vrot.slane %v1503_v1, 6  ;;  %v420_v58 = vrot.slane %v419_v51, 4  ;;  %v599_v36 = vrot.slane %v597_v61, 5 }
  0x46   : >> { %v938_v51 = vcombine.low %v1137_v6, %v1142_v7 }
  0x47   : >> { %566 = vrot.lane.b32.xlu1 %v563_v38, %s1063_s28  ;;  %v425_v38 = vrot.slane %v423_v56, 4  ;;  %v430_v59 = vor.u32 %v429_v32, %v428_v35  ;;  %v594_v47 = vor.u32 %v593_v52, %v592_v55  ;;  %967 = vmatpush3.bf16.msra.mxu0 %v940_v37  ;;  %v601_v50 = vor.u32 %v600_v42, %v599_v36 }
  0x48   : >> { %968 = vmatprep.subr.bf16.mxu0 %v947_v46  ;;  %v943_v32 = vcombine.low %v1197_v16, %v1202_v17  ;;  %v935_v55 = vcombine.low %v1505_v57, %v1504_v45 }
  0x49   : >> { %408 = vrot.lane.b32.xlu0 %v404_v43, %s1064_s30  ;;  %v424_v43 = vsel %vm1344_vm9, %v420_v58, %v423_v56  ;;  %v431_v33 = vsel %vm1344_vm9, %v425_v38, %v430_v59  ;;  %v596_v48 = vrot.slane %v594_v47, 4  ;;  %v595_v63 = vsel %vm1344_vm9, %v591_v49, %v594_v47 }
  0x4b   : >> { %410 = vrot.lane.b32.xlu1 %v407_v60, %s1064_s30  ;;  %v946_v60 = vcombine.low %v1227_v22, %v1232_v23  ;;  %969 = vmatpush3.bf16.msra.mxu0 %v939_v34  ;;  %v602_v62 = vsel %vm1344_vm9, %v596_v48, %v601_v50 }
  0x4d   : >> { %580 = vrot.lane.b32.xlu0 %v576_v40, %s1064_s30  ;;  %970 = vmatprep.subr.bf16.mxu0 %v946_v60 }
  0x4f   : >> { %582 = vrot.lane.b32.xlu1 %v579_v44, %s1064_s30  ;;  %971 = vmatpush3.bf16.msra.mxu0 %v938_v51 }
  0x50   : >> { %972 = vmatprep.subr.bf16.mxu0 %v945_v39 }
  0x51   : >> { %432 = vrot.lane.b32.xlu0 %v424_v43, %s1065_s4 }
  0x53   : >> { %434 = vrot.lane.b32.xlu1 %v431_v33, %s1065_s4  ;;  %973 = vmatpush3.bf16.msra.mxu0 %v937_v53 }
  0x54   : >> { %974 = vmatprep.subr.bf16.mxu0 %v944_v0 }
  0x55   : >> { %603 = vrot.lane.b32.xlu0 %v595_v63, %s1065_s4 }
  0x57   : >> { %605 = vrot.lane.b32.xlu1 %v602_v62, %s1065_s4  ;;  %975 = vmatpush3.bf16.msra.mxu0 %v936_v54 }
  0x58   : >> { %976 = vmatprep.subr.bf16.mxu0 %v943_v32 }
  0x5b   : >> { %977 = vmatpush3.bf16.msra.mxu0 %v935_v55  ;;  %v772_v55 = vstv %s771_s5 }
  0x5c   : >> { %vm773_vm1 = vcmp.eq.s32.totalorder %v772_v55, 1 }
  0x92   : >> { %v314_v56 = vpop.permute.xlu0 %313 }
  0x95   : >> { %v316_v35 = vpop.permute.xlu1 %315 }
  0x96   : >> { %v493_v1 = vpop.permute.xlu0 %492 }
  0x99   : >> { %v495_v52 = vpop.permute.xlu1 %494 }
  0x9a   : >> { %v292_v61 = vpop.permute.xlu0 %291 }
  0x9b   : >> { %298 = vst.msk [vmem:[#allocation2] sm:$0xf] %vm297_vm10, %v292_v61 }
  0x9c   : >> { %320 = vst.msk [vmem:[#allocation2] sm:$0xf] %vm319_vm11, %v314_v56 }
  0x9d   : >> { %v475_v37 = vpop.permute.xlu1 %474 }
  0x9e   : >> { %480 = vst.msk [vmem:[#allocation2 + $0x4] sm:$0xf] %vm297_vm10, %v475_v37 }
  0x9f   : >> { %v294_v40 = vpop.permute.xlu0 %293  ;;  %498 = vst.msk [vmem:[#allocation2 + $0x4] sm:$0xf] %vm319_vm11, %v493_v1 }
  0xa0   : >> { %299 = vst.msk [vmem:[#allocation2 + $0x8] sm:$0xf] %vm297_vm10, %v294_v40 }
  0xa1   : >> { %v477_v58 = vpop.permute.xlu1 %476  ;;  %321 = vst.msk [vmem:[#allocation2 + $0x8] sm:$0xf] %vm319_vm11, %v316_v35  ;;  %v1506_v35 = vld [vmem:[#allocation5_spill] sm:$0xff] }
  0xa2   : >> { %481 = vst.msk [vmem:[#allocation2 + $0xc] sm:$0xf] %vm297_vm10, %v477_v58 }
  0xa3   : >> { %v341_v41 = vpop.permute.xlu0 %340  ;;  %499 = vst.msk [vmem:[#allocation2 + $0xc] sm:$0xf] %vm319_vm11, %v495_v52 }
  0xa4   : >> { %347 = vst.msk [vmem:[#allocation2] sm:$0xf] %vm346_vm12, %v341_v41 }
  0xa5   : >> { %v343_v46 = vpop.permute.xlu1 %342 }
  0xa6   : >> { %348 = vst.msk [vmem:[#allocation2 + $0x8] sm:$0xf] %vm346_vm12, %v343_v46 }
  0xa7   : >> { %v516_v44 = vpop.permute.xlu0 %515 }
  0xa8   : >> { %521 = vst.msk [vmem:[#allocation2 + $0x4] sm:$0xf] %vm346_vm12, %v516_v44 }
  0xa9   : >> { %v518_v42 = vpop.permute.xlu1 %517 }
  0xaa   : >> { %522 = vst.msk [vmem:[#allocation2 + $0xc] sm:$0xf] %vm346_vm12, %v518_v42 }
  0xab   : >> { %v359_v38 = vpop.permute.xlu0 %358 }
  0xac   : >> { %365 = vst.msk [vmem:[#allocation2] sm:$0xf] %vm364_vm13, %v359_v38 }
  0xad   : >> { %v361_v59 = vpop.permute.xlu1 %360 }
  0xae   : >> { %366 = vst.msk [vmem:[#allocation2 + $0x8] sm:$0xf] %vm364_vm13, %v361_v59 }
  0xaf   : >> { %v533_v47 = vpop.permute.xlu0 %532 }
  0xb0   : >> { %538 = vst.msk [vmem:[#allocation2 + $0x4] sm:$0xf] %vm364_vm13, %v533_v47 }
  0xb1   : >> { %v535_v36 = vpop.permute.xlu1 %534 }
  0xb2   : >> { %539 = vst.msk [vmem:[#allocation2 + $0xc] sm:$0xf] %vm364_vm13, %v535_v36 }
  0xb3   : >> { %v392_v34 = vpop.permute.xlu0 %391 }
  0xb4   : >> { %398 = vst.msk [vmem:[#allocation2] sm:$0xf] %vm397_vm14, %v392_v34 }
  0xb5   : >> { %v394_v43 = vpop.permute.xlu1 %393 }
  0xb6   : >> { %399 = vst.msk [vmem:[#allocation2 + $0x8] sm:$0xf] %vm397_vm14, %v394_v43 }
  0xb7   : >> { %v565_v49 = vpop.permute.xlu0 %564 }
  0xb8   : >> { %570 = vst.msk [vmem:[#allocation2 + $0x4] sm:$0xf] %vm397_vm14, %v565_v49 }
  0xb9   : >> { %v567_v60 = vpop.permute.xlu1 %566 }
  0xba   : >> { %571 = vst.msk [vmem:[#allocation2 + $0xc] sm:$0xf] %vm397_vm14, %v567_v60 }
  0xbb   : >> { %v409_v33 = vpop.permute.xlu0 %408 }
  0xbc   : >> { %415 = vst.msk [vmem:[#allocation2] sm:$0xf] %vm414_vm15, %v409_v33 }
  0xbd   : >> { %v411_v48 = vpop.permute.xlu1 %410 }
  0xbe   : >> { %416 = vst.msk [vmem:[#allocation2 + $0x8] sm:$0xf] %vm414_vm15, %v411_v48 }
  0xbf   : >> { %v581_v50 = vpop.permute.xlu0 %580 }
  0xc0   : >> { %586 = vst.msk [vmem:[#allocation2 + $0x4] sm:$0xf] %vm414_vm15, %v581_v50 }
  0xc1   : >> { %v583_v51 = vpop.permute.xlu1 %582 }
  0xc2   : >> { %587 = vst.msk [vmem:[#allocation2 + $0xc] sm:$0xf] %vm414_vm15, %v583_v51 }
  0xc3   : >> { %v433_v63 = vpop.permute.xlu0 %432 }
  0xc4   : >> { %439 = vst.msk [vmem:[#allocation2] sm:$0xf] %vm438_vm0, %v433_v63 }
  0xc5   : >> { %v435_v39 = vpop.permute.xlu1 %434 }
  0xc6   : >> { %440 = vst.msk [vmem:[#allocation2 + $0x8] sm:$0xf] %vm438_vm0, %v435_v39 }
  0xc7   : >> { %v604_v62 = vpop.permute.xlu0 %603 }
  0xc8   : >> { %609 = vst.msk [vmem:[#allocation2 + $0x4] sm:$0xf] %vm438_vm0, %v604_v62 }
  0xc9   : >> { %v606_v53 = vpop.permute.xlu1 %605 }
  0xca   : >> { %610 = vst.msk [vmem:[#allocation2 + $0xc] sm:$0xf] %vm438_vm0, %v606_v53 }
  0xcd   : >> { %v1024_v0 = vld [vmem:[#allocation2] ss:$8 sps:$4 sm:$0xff]  }
  0xd1   : >> { %v1026_v54 = vld [vmem:[#allocation2 + $0x4] ss:$8 sps:$4 sm:$0xff]  }
  0xd2   : >> { %757 = vmatprep.mubr.bf16.mxu0 %v1026_v54 }
  0xd3   : >> { %758 = vmatmul.mubr.bf16.vlgmr.msra.gmra.mxu0 %v1024_v0 }
 0x193   : >> { %v978_v32 = vpop.f32.mrf.mxu0 }
 0x195   : >> { %v979_v45 = vpop.f32.mrf.mxu0 }
 0x196   : >> { %v980_v57 = vadd.f32 %v979_v45, %v978_v32 }
 0x197   : >> { %v981_v56 = vpop.f32.mrf.mxu0 }
 0x198   : >> { %v760_v1 = vadd.f32 %v980_v57, %v1506_v35 }
 0x199   : >> { %v982_v52 = vpop.f32.mrf.mxu0 }
 0x19a   : >> { %v766_v61 = vmax.f32 %v760_v1, 0.0  ;;  %v983_v37 = vadd.f32 %v982_v52, %v981_v56 }
 0x19c   : >> { %v780_v40 = vsel %vm773_vm1, %v766_v61, 0.0  ;;  %v763_v58 = vadd.f32 %v983_v37, %v1506_v35 }
 0x19d   : >> { %v959_v41 = vpack.c.bf16 %v780_v40, %v780_v40 }
 0x19e   : >> { %v767_v46 = vmax.f32 %v763_v58, 0.0 }
 0x19f   : >> { %794 = vst.msk [vmem:[%s792_s7] sm:$0xf] %vm793_vm2, %v959_v41  ;;  %253 = sbr.rel (!%p251_p6) target bundleno = 25 (0x19), region = 74 }
 0x1a0   : >> { %v781_v44 = vsel %vm773_vm1, %v767_v46, 0.0 }
 0x1a1   : >> { %v960_v42 = vpack.c.bf16 %v781_v44, %v781_v44 }
 0x1a3   : >> { %795 = vst.msk [vmem:[%s792_s7 + $0x4] sm:$0xf] %vm793_vm2, %v960_v42 }
 0x1a4 PF: > { %s13_s14 = sadd.s32 1, %s1053_s14   ;;  %s1507_s12 = smov %s1049_s13 }
 0x1a5   : > { %p10_p7 = scmp.ge.s32.totalorder %s13_s14, 4   ;;  %s1508_s13 = smov %s1510_s15 }
 0x1a7   :  { %12 = sbr.rel (!%p10_p7) target bundleno = 2 (0x2), region = 85 }

</bundles_post_ra>
